<compile_context>
chip_gen: v7x
topology: tpu7x:2x2x1
jax: 0.10.0
libtpu: 0.0.40
codegen_flags: <defaults>
</compile_context>

<pallas_src>
import math

import jax
import jax.numpy as jnp
import numpy as np
from jax.experimental import pallas as pl
from jax.experimental.pallas import tpu as pltpu


def _round_up(x, m):
    return ((x + m - 1) // m) * m


def _round_down(x, m):
    return (x // m) * m


def _make_attention_kernel(t_valid):
    """Kernel closure over the un-padded sequence length (static)."""

    def kernel(x_ref, w_ref, v_ref, ctx_ref, attn_ref):
        # x_ref:    (TB, T_pad, H) bf16 block of gru_output
        # w_ref:    (H, H)         bf16 attention weights
        # v_ref:    (1, H)         bf16 context vector (H on lanes)
        # ctx_ref:  (TB, H)        output context vectors (lane-dense)
        # attn_ref: (TB, T_pad)    output attention weights (lane-dense)
        TB, T, H = x_ref.shape
        x = x_ref[...]                                               # (TB, T, H) bf16

        # score = tanh(X @ W): one (TB*T, H) @ (H, H) bf16 MXU matmul, f32 acc.
        # T is padded to a multiple of 16 so both reshapes are free views.
        score = jnp.tanh(
            jnp.dot(x.reshape(TB * T, H), w_ref[...],
                    preferred_element_type=jnp.float32)
        ).reshape(TB, T, H)                                          # (TB, T, H) f32

        # logits = score @ v as a VPU multiply + lane (H) reduction; avoids an N=1
        # matmul and produces lane-dense (TB, T) directly.
        logits = jnp.sum(score * v_ref[...].astype(jnp.float32), axis=-1)   # (TB, T)

        # Mask padded sequence positions so they get zero attention weight.
        if t_valid != T:  # static Python branch at trace time
            t_idx = jax.lax.broadcasted_iota(jnp.int32, (TB, T), 1)
            logits = jnp.where(t_idx < t_valid, logits, jnp.float32(-1e30))

        # softmax over the sequence axis, per batch row (f32 throughout).
        m = jnp.max(logits, axis=-1, keepdims=True)                  # (TB, 1)
        e = jnp.exp(logits - m)                                      # (TB, T)
        attn = e * pl.reciprocal(jnp.sum(e, axis=-1, keepdims=True), approx=False)

        # context = sum_T (x * attn): VPU multiply + sublane reduce, f32 accumulate.
        # Left on the VPU on purpose (HBM-bound kernel; this is free filler).
        ctx = jnp.sum(x.astype(jnp.float32) * attn[:, :, None], axis=1)     # (TB, H)

        ctx_ref[...] = ctx.astype(ctx_ref.dtype)
        attn_ref[...] = attn.astype(attn_ref.dtype)

    return kernel


def _vmem_budget():
    """Returns (tile live-set budget bytes, vmem_limit_bytes), sized per generation.

    v5e/v6e have 128 MiB physical VMEM, v7x only 64 MiB; fall back to the v7x
    capacity if the hardware query is unavailable so the kernel is safe everywhere.
    """
    capacity = 64 * 1024 * 1024
    try:
        capacity = int(getattr(pltpu.get_tpu_info(), "vmem_capacity_bytes", capacity))
    except Exception:
        pass
    vmem_limit = min((capacity * 3) // 4, 96 * 1024 * 1024)   # v7x: 48 MiB, v5e/v6e: 96 MiB
    budget = vmem_limit // 2                                   # headroom for compiler scratch
    return budget, vmem_limit


def _choose_tb(B, T_pad, H, budget_bytes):
    """Batch elements per grid step.

    Output blocks are (tb, H) / (tb, T_pad), so tb must be a multiple of 8
    (sublane-aligned, unmasked stores) or equal to the whole padded batch.
    """
    if B <= 8:
        # Single full-batch block: block dims == array dims is always legal and a
        # single step is cheaper than padding the batch up to 8 at these sizes.
        return B

    # Live bytes per batch element per step: double-buffered bf16 X block (2 * 2B)
    # + f32 score (4B) + f32 x*attn temp (4B), plus slack.
    live_per_b = 16 * T_pad * H
    tb_cap = max(8, _round_down(budget_bytes // max(live_per_b, 1), 8))
    # ~1024 MXU rows per step amortizes the ~0.35 us/step pipeline overhead.
    tb_rows = max(8, _round_up(pl.cdiv(1024, max(T_pad, 1)), 8))
    # Keep >= 2 grid steps so both v7x TensorCores get work (no cost on v5e/v6e).
    tb_half = max(8, _round_down(pl.cdiv(B, 2), 8))
    # TODO(synk): for extreme T_pad*H where even 8 batch rows exceed the budget,
    # tile the sequence axis as a second (arbitrary) grid dimension.
    return min(tb_cap, tb_rows, tb_half)


def attention_forward(gru_output, attention_weights, context_vector):
    """gru_output: (B, T, H); attention_weights: (H, H); context_vector: (H, 1)."""
    B, T, H = gru_output.shape
    out_dtype = gru_output.dtype

    # bf16 operands: halves the X HBM stream (kernel is HBM-bound for realistic H)
    # and halves W/v DMA + VMEM residency.  All accumulation stays f32 in-kernel.
    x = gru_output.astype(jnp.bfloat16)
    w = attention_weights.astype(jnp.bfloat16)
    v_row = context_vector.reshape(1, H).astype(jnp.bfloat16)

    # Pad T to a multiple of 16 so the in-kernel (TB,T,H)->(TB*T,H) reshape is a free
    # view for bf16 tiles; padded positions are masked before the softmax.
    T_pad = _round_up(T, 16)

    budget, vmem_limit = _vmem_budget()
    tb = _choose_tb(B, T_pad, H, budget)
    n_blocks = pl.cdiv(B, tb)
    b_pad = n_blocks * tb

    if (b_pad, T_pad) != (B, T):
        # Zero-pad; padded batch rows give finite uniform-softmax output that is
        # sliced off below, padded time steps are masked in-kernel.
        x = jnp.pad(x, ((0, b_pad - B), (0, T_pad - T), (0, 0)))

    cost = pl.CostEstimate(
        flops=int(2 * B * T * H * H + 5 * B * T * H),
        transcendentals=int(B * T * H + B * T),
        bytes_accessed=int(
            b_pad * T_pad * H * 2          # X (bf16)
            + H * H * 2 + H * 2            # W, v (bf16)
            + b_pad * H * jnp.dtype(out_dtype).itemsize
            + b_pad * T_pad * jnp.dtype(out_dtype).itemsize
        ),
    )

    ctx, attn = pl.pallas_call(
        _make_attention_kernel(T),
        out_shape=(
            jax.ShapeDtypeStruct((b_pad, H), out_dtype),
            jax.ShapeDtypeStruct((b_pad, T_pad), out_dtype),
        ),
        grid_spec=pltpu.PrefetchScalarGridSpec(
            num_scalar_prefetch=0,
            grid=(n_blocks,),
            in_specs=[
                pl.BlockSpec((tb, T_pad, H), lambda b: (b, 0, 0)),
                # TODO(synk): on jax versions with BlockSpec(pipeline_mode=pl.Buffered(1)),
                # mark W/v single-buffered (constant index maps) to reclaim ~H*H bytes of
                # VMEM on v7x; omitted here to stay compatible across installs.
                pl.BlockSpec((H, H), lambda b: (0, 0)),
                pl.BlockSpec((1, H), lambda b: (0, 0)),
            ],
            out_specs=[
                pl.BlockSpec((tb, H), lambda b: (b, 0)),
                pl.BlockSpec((tb, T_pad), lambda b: (b, 0)),
            ],
        ),
        compiler_params=pltpu.CompilerParams(
            # Batch axis is embarrassingly parallel; _choose_tb guarantees >= 2 grid
            # steps for B > 8 so both v7x TensorCores can be used.
            dimension_semantics=("parallel",),
            vmem_limit_bytes=vmem_limit,
        ),
        cost_estimate=cost,
    )(x, w, v_row)

    return ctx[:B], attn[:B, :T]                                      # (B, H), (B, T)


def _xavier_uniform(key, shape, dtype=jnp.float32):
    # Matches torch.nn.init.xavier_uniform_ for 2-D tensors:
    # fan_out = shape[0], fan_in = shape[1]
    fan_out, fan_in = shape
    bound = math.sqrt(6.0 / (fan_in + fan_out))
    return jax.random.uniform(key, shape, dtype, minval=-bound, maxval=bound)


def _reference_forward(gru_output, W, v):
    score = jnp.tanh(gru_output @ W)
    logits = (score @ v)[..., 0]
    attn = jax.nn.softmax(logits, axis=1)
    ctx = jnp.sum(gru_output * attn[..., None], axis=1)
    return ctx, attn


if __name__ == "__main__":
    B, T, H = 2, 8, 32

    key = jax.random.PRNGKey(0)
    k_x, k_w, k_v = jax.random.split(key, 3)

    gru_output = jax.random.normal(k_x, (B, T, H), dtype=jnp.float32)
    attention_weights = _xavier_uniform(k_w, (H, H))
    context_vector = _xavier_uniform(k_v, (H, 1))

    ctx, attn = attention_forward(gru_output, attention_weights, context_vector)
    ctx, attn = jax.block_until_ready((ctx, attn))

    ctx_ref, attn_ref = _reference_forward(gru_output, attention_weights, context_vector)

    # Kernel uses bf16 operands with f32 accumulation -> compare with loosened tolerance.
    np.testing.assert_allclose(np.asarray(ctx), np.asarray(ctx_ref), rtol=2e-2, atol=2e-2)
    np.testing.assert_allclose(np.asarray(attn), np.asarray(attn_ref), rtol=2e-2, atol=2e-2)
    # Softmax rows (including masked padded positions) still sum to ~1.
    np.testing.assert_allclose(np.asarray(attn).sum(-1), np.ones(B), rtol=1e-5, atol=1e-5)

    print("KERNEL_OK")
</pallas_src>

<mosaic_0001>
module attributes {stable_mosaic.version = 11 : i64} {
  func.func @kernel(%arg0: i32, %arg1: memref<2x16x32xbf16, #tpu.memory_space<vmem>>, %arg2: memref<32x32xbf16, #tpu.memory_space<vmem>>, %arg3: memref<1x32xbf16, #tpu.memory_space<vmem>>, %arg4: memref<2x32xf32, #tpu.memory_space<vmem>>, %arg5: memref<2x16xf32, #tpu.memory_space<vmem>>) attributes {dimension_semantics = [#tpu.dimension_semantics<parallel>], iteration_bounds = array<i64: 1>, scalar_prefetch = 0 : i64, scratch_operands = 0 : i64, tpu.core_type = #tpu.core_type<tc>, window_params = [{transform_indices = @transform_0, window_bounds = array<i64: 2, 16, 32>}, {pipeline_mode = #tpu.pipeline_mode<synchronous>, transform_indices = @transform_1, window_bounds = array<i64: 32, 32>}, {pipeline_mode = #tpu.pipeline_mode<synchronous>, transform_indices = @transform_2, window_bounds = array<i64: 1, 32>}, {transform_indices = @transform_3, window_bounds = array<i64: 2, 32>}, {transform_indices = @transform_4, window_bounds = array<i64: 2, 16>}]} {
    %c0 = arith.constant 0 : index
    %c0_0 = arith.constant 0 : index
    %c0_1 = arith.constant 0 : index
    %0 = vector.load %arg1[%c0, %c0_0, %c0_1] : memref<2x16x32xbf16, #tpu.memory_space<vmem>>, vector<2x16x32xbf16>
    %1 = vector.shape_cast %0 : vector<2x16x32xbf16> to vector<32x32xbf16>
    %c0_2 = arith.constant 0 : index
    %c0_3 = arith.constant 0 : index
    %2 = vector.load %arg2[%c0_2, %c0_3] : memref<32x32xbf16, #tpu.memory_space<vmem>>, vector<32x32xbf16>
    %cst = arith.constant dense<0.000000e+00> : vector<32x32xf32>
    %3 = tpu.matmul %1, %2, %cst {dimension_numbers = #tpu.dot_dimension_numbers<[1], [0], [0], [1], [0, 0, 1, 1], [], []>} : vector<32x32xbf16>, vector<32x32xbf16>, vector<32x32xf32> -> vector<32x32xf32>
    %4 = math.tanh %3 : vector<32x32xf32>
    %5 = vector.shape_cast %4 : vector<32x32xf32> to vector<2x16x32xf32>
    %c0_4 = arith.constant 0 : index
    %c0_5 = arith.constant 0 : index
    %6 = vector.load %arg3[%c0_4, %c0_5] : memref<1x32xbf16, #tpu.memory_space<vmem>>, vector<1x32xbf16>
    %7 = arith.extf %6 : vector<1x32xbf16> to vector<1x32xf32>
    %8 = vector.shape_cast %7 : vector<1x32xf32> to vector<1x1x32xf32>
    %9 = vector.broadcast %8 : vector<1x1x32xf32> to vector<2x16x32xf32>
    %10 = arith.mulf %5, %9 : vector<2x16x32xf32>
    %cst_6 = arith.constant dense<0.000000e+00> : vector<2x16xf32>
    %11 = vector.multi_reduction <add>, %10, %cst_6 [2] : vector<2x16x32xf32> to vector<2x16xf32>
    %12 = tpu.iota {dimensions = array<i32: 1>} : vector<2x16xi32>
    %c8_i32 = arith.constant 8 : i32
    %13 = vector.broadcast %c8_i32 : i32 to vector<2x16xi32>
    %14 = arith.cmpi slt, %12, %13 : vector<2x16xi32>
    %cst_7 = arith.constant -1.000000e+30 : f32
    %15 = vector.broadcast %cst_7 : f32 to vector<2x16xf32>
    %16 = arith.select %14, %11, %15 : vector<2x16xi1>, vector<2x16xf32>
    %cst_8 = arith.constant dense<0xFF800000> : vector<2xf32>
    %17 = vector.multi_reduction <maximumf>, %16, %cst_8 [1] : vector<2x16xf32> to vector<2xf32>
    %18 = vector.shape_cast %17 : vector<2xf32> to vector<2x1xf32>
    %19 = vector.broadcast %18 : vector<2x1xf32> to vector<2x16xf32>
    %20 = arith.subf %16, %19 : vector<2x16xf32>
    %21 = math.exp %20 : vector<2x16xf32>
    %cst_9 = arith.constant dense<0.000000e+00> : vector<2xf32>
    %22 = vector.multi_reduction <add>, %21, %cst_9 [1] : vector<2x16xf32> to vector<2xf32>
    %23 = vector.shape_cast %22 : vector<2xf32> to vector<2x1xf32>
    %24 = tpu.reciprocal %23 : vector<2x1xf32> -> vector<2x1xf32>
    %25 = vector.broadcast %24 : vector<2x1xf32> to vector<2x16xf32>
    %26 = arith.mulf %21, %25 : vector<2x16xf32>
    %27 = arith.extf %0 : vector<2x16x32xbf16> to vector<2x16x32xf32>
    %28 = vector.shape_cast %26 : vector<2x16xf32> to vector<2x16x1xf32>
    %29 = vector.broadcast %28 : vector<2x16x1xf32> to vector<2x16x32xf32>
    %30 = arith.mulf %27, %29 : vector<2x16x32xf32>
    %cst_10 = arith.constant dense<0.000000e+00> : vector<2x32xf32>
    %31 = vector.multi_reduction <add>, %30, %cst_10 [1] : vector<2x16x32xf32> to vector<2x32xf32>
    %c0_11 = arith.constant 0 : index
    %c0_12 = arith.constant 0 : index
    %32 = vector.load %arg4[%c0_11, %c0_12] : memref<2x32xf32, #tpu.memory_space<vmem>>, vector<2x32xf32>
    tpu.vector_store %arg4[%c0_11, %c0_12], %31 {strides = array<i32>} : memref<2x32xf32, #tpu.memory_space<vmem>>, vector<2x32xf32>,
    %c0_13 = arith.constant 0 : index
    %c0_14 = arith.constant 0 : index
    %33 = vector.load %arg5[%c0_13, %c0_14] : memref<2x16xf32, #tpu.memory_space<vmem>>, vector<2x16xf32>
    tpu.vector_store %arg5[%c0_13, %c0_14], %26 {strides = array<i32>} : memref<2x16xf32, #tpu.memory_space<vmem>>, vector<2x16xf32>,
    return
  }
  func.func @transform_0(%arg0: i32) -> (i32, i32, i32) {
    %c0_i32 = arith.constant 0 : i32
    %c0_i32_0 = arith.constant 0 : i32
    %c0_i32_1 = arith.constant 0 : i32
    return %arg0, %c0_i32, %c0_i32_0 : i32, i32, i32
  }
  func.func @transform_1(%arg0: i32) -> (i32, i32) {
    %c0_i32 = arith.constant 0 : i32
    %c0_i32_0 = arith.constant 0 : i32
    %c0_i32_1 = arith.constant 0 : i32
    return %c0_i32, %c0_i32_0 : i32, i32
  }
  func.func @transform_2(%arg0: i32) -> (i32, i32) {
    %c0_i32 = arith.constant 0 : i32
    %c0_i32_0 = arith.constant 0 : i32
    %c0_i32_1 = arith.constant 0 : i32
    return %c0_i32, %c0_i32_0 : i32, i32
  }
  func.func @transform_3(%arg0: i32) -> (i32, i32) {
    %c0_i32 = arith.constant 0 : i32
    %c0_i32_0 = arith.constant 0 : i32
    return %arg0, %c0_i32 : i32, i32
  }
  func.func @transform_4(%arg0: i32) -> (i32, i32) {
    %c0_i32 = arith.constant 0 : i32
    %c0_i32_0 = arith.constant 0 : i32
    return %arg0, %c0_i32 : i32, i32
  }
}

</mosaic_0001>

<bundles_post_ra>
// kernel: tpu_custom_call.1
= control target key start
LH: loop header
LB: loop body
LE: loop exit
PB: predicated region body
PF: predicated region fallthrough
CT: control target
= control target key end

     0   :  { %10 = vsyncpa [#allocation3], 0  ;;  %s538_s0 = inlined_call_operand.hbm [shape: bf16[2,16,32], index: 0, kind: input, shape index: {}]   ;;  %s539_s1 = inlined_call_operand.hbm [shape: bf16[32,32], index: 1, kind: input, shape index: {}]   ;;  %s540_s2 = inlined_call_operand.vmem [shape: bf16[1,32], index: 2, kind: input, shape index: {}]   ;;  %s541_s3 = inlined_call_operand.hbm [shape: f32[2,32], index: 3, kind: output, shape index: {0}]   ;;  %s542_s4 = inlined_call_operand.hbm [shape: f32[2,16], index: 4, kind: output, shape index: {1}]  }
   0x1   :  { %11 = vsyncpa [#allocation6], 0 }
   0x2   :  { %12 = vsyncpa [#allocation4], 0 }
   0x3   :  { %13 = vsyncpa [#allocation9], 0  ;;  %s425_s15 = smov [#allocation2]   ;;  %s329_s19 = scalar_lea.hbm %s538_s0, 256 }
   0x4   :  { %s19_s16 = sshll.u32 %s425_s15, 4  ;;  %p330_p0 = scmp.ne.s32.totalorder %s538_s0, %s329_s19  ;;  %s20_s16 = int_to_ptr.vmem [resolvable:$true] %s19_s16 }
   0x5   :  { %p333_p1 = scmp.lt.u32.totalorder %s329_s19, %s538_s0 }
   0x7   :  { %p335_p2 = pnand %p333_p1, %p330_p0 }
   0x9   :  { %338 = shalt.err (!%p335_p2)
}
   0xa   :  { %s339_s24 = scalar_lea.vmem %s20_s16, 256  ;;  %p344_p4 = scmp.lt.s32.totalorder %s20_s16, %s20_s16 }
   0xb   :  { %p340_p3 = scmp.ne.s32.totalorder %s20_s16, %s339_s24  ;;  %p345_p5 = scmp.lt.s32.totalorder %s339_s24, %s339_s24 }
   0xd   :  { %p346_p6 = por %p345_p5, %p344_p4 }
   0xf   :  { %p347_p7 = pnand %p346_p6, %p340_p3 }
  0x11   :  { %350 = shalt.err (!%p347_p7)
}
  0x12   :  { %s426_s25 = smov 64   ;;  %s427_s26 = smov 4  }
  0x13   :  { %25 = dma.hbm_to_vmem [thread:$0]  %s538_s0, 256, %s20_s16, [#allocation3], %s426_s25, %s426_s25, %s427_s26  }
  0x14   :  { %s428_s29 = smov [#allocation5]   ;;  %s351_s7 = scalar_lea.hbm %s539_s1, 256 }
  0x15   :  { %s31_s30 = sshll.u32 %s428_s29, 4  ;;  %p352_p8 = scmp.ne.s32.totalorder %s539_s1, %s351_s7  ;;  %s32_s30 = int_to_ptr.vmem [resolvable:$true] %s31_s30 }
  0x16   :  { %p355_p9 = scmp.lt.u32.totalorder %s351_s7, %s539_s1 }
  0x18   :  { %p357_p10 = pnand %p355_p9, %p352_p8 }
  0x1a   :  { %360 = shalt.err (!%p357_p10)
}
  0x1b   :  { %s361_s12 = scalar_lea.vmem %s32_s30, 256  ;;  %p366_p12 = scmp.lt.s32.totalorder %s32_s30, %s32_s30 }
  0x1c   :  { %p362_p11 = scmp.ne.s32.totalorder %s32_s30, %s361_s12  ;;  %p367_p13 = scmp.lt.s32.totalorder %s361_s12, %s361_s12 }
  0x1e   :  { %p368_p0 = por %p367_p13, %p366_p12 }
  0x20   :  { %p369_p1 = pnand %p368_p0, %p362_p11 }
  0x22   :  { %372 = shalt.err (!%p369_p1)
}
  0x23   :  { %37 = dma.hbm_to_vmem [thread:$0]  %s539_s1, 256, %s32_s30, [#allocation6], %s426_s25, %s426_s25, %s427_s26  }
  0x24   :  { %417 = dma.done.wait [#allocation3], 256  }
  0x25   :  { %418 = vsyncadd [#allocation3], 4294967040 }
  0x26   :  { %419 = dma.done.wait [#allocation6], 256  }
  0x27   :  { %420 = vsyncadd [#allocation6], 4294967040  ;;  %v311_v0 = vld [vmem:[#allocation5] sm:$0xff]   ;;  %v312_v1 = vld [vmem:[#allocation5 + $0x8] sm:$0xff]   ;;  %vm77_vm0 = vcmask 261120   ;;  %v139_v4 = vlaneseq  ;;  %vm175_vm1 = vcmask 130112  }
  0x28   :  { %297 = vmatprep.subr.bf16.mxu0 %v311_v0  ;;  %v480_v2 = vld [vmem:[#allocation2] sm:$0xff]   ;;  %v482_v3 = vld [vmem:[#allocation2 + $0x8] sm:$0xff]   ;;  %vm186_vm2 = vcmask 1041409   ;;  %vm190_vm4 = vcmask 123904  }
  0x29   :  { %298 = vmatpush3.bf16.msra.mxu0 %v311_v0  ;;  %301 = vmatprep.mubr.msk.bf16.mxu0 %vm77_vm0, %v480_v2  ;;  %v488_v6 = vshrl.u32 %v139_v4, 7  ;;  %v137_v8 = vld [vmem:[%s540_s2] sm:$0x1]  ;;  %v160_v26 = vand.u32 127, %v139_v4  ;;  %s429_s2 = smov [#allocation8]  }
  0x2a   :  { %299 = vmatprep.subr.bf16.mxu0 %v312_v1  ;;  %v138_v11 = vunpack.c.l.bf16 %v137_v8  ;;  %s273_s15 = sshll.u32 %s429_s2, 4  ;;  %s274_s15 = int_to_ptr.vmem [resolvable:$true] %s273_s15 }
  0x2b   :  { %v141_v12 = vsub.s32 0, %v488_v6  ;;  %v170_v27 = vadd.s32 4294967288, %v160_v26  ;;  %v168_v29 = vsub.s32 %v160_v26, %v488_v6  ;;  %vm161_vm3 = vcmp.lt.s32.totalorder %v160_v26, 8  ;;  %s373_s16 = scalar_lea.vmem %s274_s15, 32  ;;  %p378_p3 = scmp.lt.s32.totalorder %s274_s15, %s274_s15 }
  0x2c   :  { %v219_v52 = vsub.s32 1, %v488_v6  ;;  %p374_p2 = scmp.ne.s32.totalorder %s274_s15, %s373_s16  ;;  %p379_p4 = scmp.lt.s32.totalorder %s373_s16, %s373_s16 }
  0x2d   :  { %300 = vmatpush3.bf16.msra.mxu0 %v312_v1  ;;  %v142_v13 = vrot.slane %v138_v11, %v141_v12  ;;  %v173_v31 = vsub.s32 %v170_v27, %v488_v6 }
  0x2e   :  { %p380_p5 = por %p379_p4, %p378_p3 }
  0x30   :  { %302 = vmatmul.mubr.msk.bf16.vlgmr.msra.gmra.mrb[0].mxu0 %vm77_vm0, %v482_v3  ;;  %p381_p6 = pnand %p380_p5, %p374_p2 }
 0x103   :  { %v303_v5 = vpop.f32.mrb[0].mxu0 }
 0x104   :  { %317 = vtanh.f32 %v303_v5  ;;  %v118_v7 = vpop.f32.mrb[1].mxu0 }
 0x105   :  { %319 = vtanh.f32 %v118_v7  ;;  %v304_v9 = vpop.f32.mrb[2].mxu0 }
 0x106   :  { %321 = vtanh.f32 %v304_v9  ;;  %v121_v10 = vpop.f32.mrb[3].mxu0 }
 0x107   :  { %323 = vtanh.f32 %v121_v10 }
 0x10e   :  { %v318_v14 = vpop.eup %317 }
 0x10f   :  { %v320_v15 = vpop.eup %319  ;;  %v145_v16 = vmul.f32 %v318_v14, %v142_v13 }
 0x110   :  { %v322_v17 = vpop.eup %321  ;;  %v143_v18 = vmul.f32 %v320_v15, %v142_v13 }
 0x111   :  { %v324_v19 = vpop.eup %323  ;;  %v153_v20 = vsel %vm77_vm0, %v145_v16, 0.0  ;;  %v146_v21 = vmul.f32 %v322_v17, %v142_v13 }
 0x112   :  { %154 = vadd.xlane.f32.xlu1 %v153_v20  ;;  %v147_v22 = vsel %vm77_vm0, %v143_v18, 0.0  ;;  %v144_v23 = vmul.f32 %v324_v19, %v142_v13 }
 0x113   :  { %148 = vadd.xlane.f32.xlu0 %v147_v22  ;;  %v156_v24 = vsel %vm77_vm0, %v146_v21, 0.0 }
 0x114   :  { %v150_v25 = vsel %vm77_vm0, %v144_v23, 0.0 }
 0x116   :  { %157 = vadd.xlane.f32.xlu1 %v156_v24 }
 0x117   :  { %151 = vadd.xlane.f32.xlu0 %v150_v25 }
 0x19f   :  { %v155_v28 = vpop.xlane.xlu1 %154 }
 0x1a0   :  { %v149_v30 = vpop.xlane.xlu0 %148  ;;  %v180_v33 = vrot.slane %v155_v28, %v168_v29 }
 0x1a1   :  { %v169_v36 = vrot.slane %v149_v30, %v168_v29 }
 0x1a3   :  { %v158_v32 = vpop.xlane.xlu1 %157 }
 0x1a4   :  { %v184_v34 = vrot.slane %v158_v32, %v173_v31  ;;  %v152_v35 = vpop.xlane.xlu0 %151 }
 0x1a5   :  { %v174_v37 = vrot.slane %v152_v35, %v173_v31 }
 0x1a6   :  { %v185_v38 = vsel %vm175_vm1, %v184_v34, %v180_v33 }
 0x1a7   :  { %v176_v39 = vsel %vm175_vm1, %v174_v37, %v169_v36 }
 0x1a8   :  { %v187_v40 = vsel %vm186_vm2, %v185_v38, %v176_v39 }
 0x1a9   :  { %v189_v41 = vsel %vm161_vm3, %v187_v40, -1e+30 }
 0x1aa   :  { %v191_v42 = vsel %vm190_vm4, %v189_v41, -inf }
 0x1ab   :  { %192 = vmax.xlane.f32.xlu0 %v191_v42 }
 0x238   :  { %v193_v43 = vpop.xlane.xlu0 %192 }
 0x239   :  { %v194_v44 = vsub.f32 %v189_v41, %v193_v43 }
 0x23b   :  { %v195_v45 = vmul.f32 1.442695, %v194_v44 }
 0x23d   :  { %325 = vpow2.f32 %v195_v45 }
 0x247   :  { %v326_v46 = vpop.eup %325 }
 0x248   :  { %v197_v47 = vsel %vm190_vm4, %v326_v46, 0.0 }
 0x249   :  { %198 = vadd.xlane.f32.xlu1 %v197_v47 }
 0x2d6   :  { %v199_v48 = vpop.xlane.xlu1 %198 }
 0x2d7   :  { %327 = vrcp.f32 %v199_v48 }
 0x2e1   :  { %v328_v49 = vpop.eup %327 }
 0x2e2   :  { %v201_v50 = vmul.f32 %v328_v49, %v326_v46 }
 0x2e4   :  { %v209_v51 = vrot.slane %v201_v50, %v141_v12  ;;  %256 = vst.msk [vmem:[#allocation8] sm:$0x3] %vm190_vm4, %v201_v50  ;;  %v220_v53 = vrot.slane %v201_v50, %v219_v52 }
 0x2e6   :  { %215 = vbcast.lane.b32.xlu1 %v209_v51, 264  ;;  %211 = vbcast.lane.b32.xlu0 %v209_v51, 256 }
 0x2ea   :  { %222 = vbcast.lane.b32.xlu1 %v220_v53, 256 }
 0x2ee   :  { %226 = vbcast.lane.b32.xlu1 %v220_v53, 264 }
 0x2ef   :  { %384 = shalt.err (!%p381_p6)
}
 0x2f0   :  { %s385_s19 = scalar_lea.hbm %s542_s4, 32 }
 0x2f1   :  { %p386_p7 = scmp.ne.s32.totalorder %s542_s4, %s385_s19  ;;  %p389_p8 = scmp.lt.u32.totalorder %s385_s19, %s542_s4 }
 0x2f3   :  { %p391_p9 = pnand %p389_p8, %p386_p7 }
 0x2f5   :  { %394 = shalt.err (!%p391_p9)
}
 0x2f6   :  { %276 = dma.vmem_to_hbm [thread:$0]  %s274_s15, 32, %s542_s4, [#allocation9]   ;;  %v203_v54 = vunpack.c.h.bf16 %v480_v2  ;;  %v202_v55 = vunpack.c.l.bf16 %v480_v2  ;;  %v204_v62 = vunpack.c.l.bf16 %v482_v3  ;;  %v205_v1 = vunpack.c.h.bf16 %v482_v3 }
 0x2f7   :  { %s430_s4 = smov [#allocation7]   ;;  %vm254_vm5 = vcmask 254976  }
 0x2f8   :  { %s263_s26 = sshll.u32 %s430_s4, 4  ;;  %s264_s26 = int_to_ptr.vmem [resolvable:$true] %s263_s26 }
 0x2f9   :  { %s395_s27 = scalar_lea.vmem %s264_s26, 32  ;;  %p400_p11 = scmp.lt.s32.totalorder %s264_s26, %s264_s26 }
 0x2fa   :  { %p396_p10 = scmp.ne.s32.totalorder %s264_s26, %s395_s27  ;;  %p401_p12 = scmp.lt.s32.totalorder %s395_s27, %s395_s27 }
 0x2fc   :  { %p402_p13 = por %p401_p12, %p400_p11 }
 0x2fe   :  { %p403_p0 = pnand %p402_p13, %p396_p10 }
 0x358   :  { %v216_v56 = vpop.permute.xlu1 %215  ;;  %v212_v57 = vpop.permute.xlu0 %211 }
 0x359   :  { %v229_v58 = vmul.f32 %v216_v56, %v203_v54  ;;  %v228_v59 = vmul.f32 %v212_v57, %v202_v55 }
 0x35b   :  { %v233_v60 = vsel %vm77_vm0, %v229_v58, 0.0  ;;  %v232_v61 = vsel %vm77_vm0, %v228_v59, 0.0 }
 0x35c   :  { %v234_v63 = vadd.f32 %v233_v60, %v232_v61  ;;  %v223_v0 = vpop.permute.xlu1 %222 }
 0x35d   :  { %v230_v5 = vmul.f32 %v223_v0, %v204_v62 }
 0x35e   :  { %v235_v4 = vrot.slane %v234_v63, 4 }
 0x35f   :  { %v241_v2 = vsel %vm77_vm0, %v230_v5, 0.0 }
 0x360   :  { %v236_v6 = vadd.f32 %v235_v4, %v234_v63  ;;  %v227_v7 = vpop.permute.xlu1 %226 }
 0x361   :  { %v231_v8 = vmul.f32 %v227_v7, %v205_v1 }
 0x362   :  { %v237_v10 = vrot.slane %v236_v6, 2 }
 0x363   :  { %v242_v9 = vsel %vm77_vm0, %v231_v8, 0.0 }
 0x364   :  { %v243_v11 = vadd.f32 %v242_v9, %v241_v2  ;;  %v238_v13 = vadd.f32 %v237_v10, %v236_v6 }
 0x366   :  { %v244_v12 = vrot.slane %v243_v11, 4  ;;  %v239_v16 = vrot.slane %v238_v13, 1 }
 0x368   :  { %v245_v14 = vadd.f32 %v244_v12, %v243_v11  ;;  %v240_v3 = vadd.f32 %v239_v16, %v238_v13 }
 0x36a   :  { %v246_v15 = vrot.slane %v245_v14, 2 }
 0x36c   :  { %v247_v17 = vadd.f32 %v246_v15, %v245_v14 }
 0x36e   :  { %v248_v18 = vrot.slane %v247_v17, 1 }
 0x370   :  { %v249_v19 = vadd.f32 %v248_v18, %v247_v17 }
 0x372   :  { %v252_v20 = vsel %vm186_vm2, %v249_v19, %v240_v3 }
 0x373   :  { %255 = vst.msk [vmem:[#allocation7] sm:$0x3] %vm254_vm5, %v252_v20 }
 0x374   :  { %406 = shalt.err (!%p403_p0)
}
 0x375   :  { %s407_s30 = scalar_lea.hbm %s541_s3, 32 }
 0x376   :  { %p408_p1 = scmp.ne.s32.totalorder %s541_s3, %s407_s30  ;;  %p411_p2 = scmp.lt.u32.totalorder %s407_s30, %s541_s3 }
 0x378   :  { %p413_p3 = pnand %p411_p2, %p408_p1 }
 0x37a   :  { %416 = shalt.err (!%p413_p3)
}
 0x37b   :  { %266 = dma.vmem_to_hbm [thread:$0]  %s264_s26, 32, %s541_s3, [#allocation4]  }
 0x37c   :  { %421 = dma.done.wait [#allocation4], 32  }
 0x37d   :  { %422 = vsyncadd [#allocation4], 4294967264 }
 0x37e   :  { %423 = dma.done.wait [#allocation9], 32  }
 0x37f   :  { %424 = vsyncadd [#allocation9], 4294967264 }
 0x380   :  { %283 = vsyncpa [#allocation3], 1 }
 0x381   :  { %284 = vsyncpa [#allocation6], 1 }
 0x382   :  { %285 = vsyncpa [#allocation4], 1 }
 0x383   :  { %286 = vsyncpa [#allocation9], 1 }

</bundles_post_ra>
